<compile_context>
chip_gen: v6e
topology: v6e:2x2x1
jax: 0.10.0
libtpu: 0.0.40
codegen_flags: <defaults>
</compile_context>

<pallas_src>
import jax
import jax.numpy as jnp
from jax.experimental import pallas as pl
from jax.experimental.pallas import tpu as pltpu


def _rpnet_kernel(x_ref, we_ref, bw_ref, bc_ref, out_ref, acc_ref):
    """One (batch-tile i, emb-tile e) grid step.

    x_ref  : [2, tb, D_in] compute dtype  -- both views of this batch tile
    we_ref : [D_in, tE]    compute dtype  -- embedder weight chunk
    bw_ref : [2, tE]       f32            -- row 0 = b_e chunk, row 1 = w_clf chunk
    bc_ref : [1]           f32 (SMEM)     -- classifier bias
    out_ref: [tb, 1]       f32
    acc_ref: [tb, 1]       f32 scratch    -- logits accumulator over the E axis
    """
    e = pl.program_id(1)
    tb = x_ref.shape[1]
    d_in = x_ref.shape[2]

    @pl.when(e == 0)
    def _():
        acc_ref[...] = jnp.zeros_like(acc_ref)

    # Fused embedder: ONE MXU matmul over both views.  Merging (2, tb) -> 2*tb
    # sublanes is a layout no-op when tb is sublane-aligned.
    x = x_ref[...].reshape(2 * tb, d_in)                               # [2*tb, D_in]
    z = jnp.dot(x, we_ref[...], preferred_element_type=jnp.float32)    # [2*tb, tE] f32

    bw = bw_ref[...]                                                   # [2, tE] (one vld)
    z = jnp.maximum(z + bw[0:1, :], 0.0)                               # bias + ReLU (VPU)

    # Static split back into the two views and contrastive distance.
    d = jnp.abs(z[:tb] - z[tb:])                                       # [tb, tE]

    # Classifier head (out_features == 1): VPU multiply + cross-lane (XLU)
    # reduction, no MXU op whose N=1 result drain would dominate.
    acc_ref[...] += jnp.sum(d * bw[1:2, :], axis=-1, keepdims=True)    # [tb, 1]

    @pl.when(e == pl.num_programs(1) - 1)
    def _():
        out_ref[...] = (acc_ref[...] + bc_ref[0]).astype(out_ref.dtype)


def contrastive_rpnet_forward(x1, x2, w_emb, b_emb, w_clf, b_clf, *,
                              block_b=256, block_e=512,
                              compute_dtype=jnp.bfloat16):
    """x1, x2: [B, D_in]; w_emb: [D_in, E]; b_emb: [1, E]; w_clf: [E, 1]; b_clf: [1, 1].

    Grid is (B // tb, E // tE); the E (reduction) axis is last and "arbitrary",
    the batch axis is "parallel".  Per-generation tuning: on v7x use
    block_b <= B // 2 (both TensorCores) and ~256 rows (64 MiB VMEM); on
    v5e/v6e grow block_b to 1024-2048 to amortize per-step overhead.
    """
    B, D_in = x1.shape
    E = w_emb.shape[1]

    tb = B if B <= block_b else block_b
    te = E if E <= block_e else block_e
    # TODO(synk): ragged B / E (not multiples of the tile) need padding or a
    # pl.BoundedSlice / pl.when-guarded tail tile.
    assert B % tb == 0, "batch must be a multiple of the batch tile"
    assert E % te == 0, "emb_size must be a multiple of the emb tile"
    nb, ne = B // tb, E // te

    # Pre-stack both views -> one operand, one DMA per batch tile; cast MXU
    # inputs to the compute dtype (bf16 by default, f32 accumulation inside).
    x = jnp.stack([x1, x2], axis=0).astype(compute_dtype)              # [2, B, D_in]
    we = w_emb.astype(compute_dtype)                                   # [D_in, E]
    # Fused lane-dense parameter pair: row 0 = b_e, row 1 = w_clf (kept f32).
    bw = jnp.concatenate([jnp.reshape(b_emb, (1, E)),
                          jnp.reshape(w_clf, (1, E))], axis=0).astype(jnp.float32)
    bc = jnp.reshape(b_clf, (1,)).astype(jnp.float32)                  # scalar -> SMEM

    # Single-buffer grid-invariant weights (default pipelining would
    # double-buffer them for zero benefit).  When E is tiled they vary with
    # the e axis, so keep the default double-buffering for overlap.
    if ne == 1:
        we_spec = pl.BlockSpec((D_in, te), lambda i, e: (0, e),
                               pipeline_mode=pl.Buffered(1))
        bw_spec = pl.BlockSpec((2, te), lambda i, e: (0, e),
                               pipeline_mode=pl.Buffered(1))
    else:
        we_spec = pl.BlockSpec((D_in, te), lambda i, e: (0, e))
        bw_spec = pl.BlockSpec((2, te), lambda i, e: (0, e))

    return pl.pallas_call(
        _rpnet_kernel,
        out_shape=jax.ShapeDtypeStruct((B, 1), jnp.float32),
        grid=(nb, ne),
        in_specs=[
            pl.BlockSpec((2, tb, D_in), lambda i, e: (0, i, 0)),       # stacked views
            we_spec,                                                    # W_e chunk
            bw_spec,                                                    # [b_e; w_clf] chunk
            pl.BlockSpec(memory_space=pltpu.MemorySpace.SMEM),          # b_clf scalar
        ],
        out_specs=pl.BlockSpec((tb, 1), lambda i, e: (i, 0)),
        scratch_shapes=[pltpu.VMEM((tb, 1), jnp.float32)],
        compiler_params=pltpu.CompilerParams(
            dimension_semantics=("parallel", "arbitrary")),
    )(x, we, bw, bc)


def _reference(x1, x2, w_emb, b_emb, w_clf, b_clf):
    z1 = jnp.maximum(x1 @ w_emb + b_emb, 0.0)
    z2 = jnp.maximum(x2 @ w_emb + b_emb, 0.0)
    return jnp.abs(z1 - z2) @ w_clf + b_clf


def _make_inputs(B, D_in, E, key):
    k1, k2, k3, k4, k5, k6 = jax.random.split(key, 6)
    x1 = jax.random.normal(k1, (B, D_in), dtype=jnp.float32)
    x2 = jax.random.normal(k2, (B, D_in), dtype=jnp.float32)
    # Deterministic parameter init (synthetic, not a checkpoint load).
    w_emb = jax.random.normal(k3, (D_in, E), dtype=jnp.float32) * (1.0 / jnp.sqrt(D_in))
    b_emb = jax.random.normal(k4, (1, E), dtype=jnp.float32) * 0.01
    w_clf = jax.random.normal(k5, (E, 1), dtype=jnp.float32) * (1.0 / jnp.sqrt(E))
    b_clf = jax.random.normal(k6, (1, 1), dtype=jnp.float32) * 0.01
    return x1, x2, w_emb, b_emb, w_clf, b_clf


if __name__ == "__main__":
    # Case 1: small module shapes (batch=8, D_in=32, emb_size=32) -> grid (1,1),
    # single-buffered resident weights.  f32 compute path: tight check.
    B, D_in, E = 8, 32, 32
    args = _make_inputs(B, D_in, E, jax.random.PRNGKey(0))
    out = jax.block_until_ready(
        contrastive_rpnet_forward(*args, compute_dtype=jnp.float32))
    ref = _reference(*args)
    assert out.shape == (B, 1)
    assert jnp.allclose(out, ref, atol=1e-5, rtol=1e-5)

    # Case 1b: default bf16-MXU / f32-accumulate path on the same inputs
    # (tolerance relaxed for the bf16 input cast).
    out_bf16 = jax.block_until_ready(contrastive_rpnet_forward(*args))
    assert out_bf16.shape == (B, 1)
    assert jnp.allclose(out_bf16, ref, atol=5e-2, rtol=5e-2)

    # Case 2: exercise the multi-tile grid (2 batch tiles x 2 emb tiles) with
    # the logits accumulator and E-chunked weights.
    B2, D2, E2 = 16, 32, 256
    args2 = _make_inputs(B2, D2, E2, jax.random.PRNGKey(1))
    out2 = jax.block_until_ready(
        contrastive_rpnet_forward(*args2, block_b=8, block_e=128,
                                  compute_dtype=jnp.float32))
    ref2 = _reference(*args2)
    assert out2.shape == (B2, 1)
    assert jnp.allclose(out2, ref2, atol=1e-4, rtol=1e-4)

    print("KERNEL_OK")
</pallas_src>

<mosaic_0001>
module attributes {stable_mosaic.version = 11 : i64} {
  func.func @_rpnet_kernel(%arg0: i32, %arg1: i32, %arg2: memref<2x8x32xf32, #tpu.memory_space<vmem>>, %arg3: memref<32x32xf32, #tpu.memory_space<vmem>>, %arg4: memref<2x32xf32, #tpu.memory_space<vmem>>, %arg5: memref<1xf32, #tpu.memory_space<smem>>, %arg6: memref<8x1xf32, #tpu.memory_space<vmem>>, %arg7: memref<8x1xf32, #tpu.memory_space<vmem>>) attributes {dimension_semantics = [#tpu.dimension_semantics<parallel>, #tpu.dimension_semantics<arbitrary>], iteration_bounds = array<i64: 1, 1>, scalar_prefetch = 0 : i64, scratch_operands = 1 : i64, tpu.core_type = #tpu.core_type<tc>, window_params = [{transform_indices = @transform_0, window_bounds = array<i64: 2, 8, 32>}, {pipeline_mode = #tpu.pipeline_mode<synchronous>, transform_indices = @transform_1, window_bounds = array<i64: 32, 32>}, {pipeline_mode = #tpu.pipeline_mode<synchronous>, transform_indices = @transform_2, window_bounds = array<i64: 2, 32>}, {transform_indices = @transform_3, window_bounds = array<i64: 1>}, {transform_indices = @transform_4, window_bounds = array<i64: 8, 1>}]} {
    %c0_i32 = arith.constant 0 : i32
    %0 = arith.cmpi eq, %arg1, %c0_i32 : i32
    %1 = arith.extui %0 : i1 to i32
    %c0_i32_0 = arith.constant 0 : i32
    %2 = arith.cmpi ne, %1, %c0_i32_0 : i32
    scf.if %2 {
      %cst_15 = arith.constant 0.000000e+00 : f32
      %28 = vector.broadcast %cst_15 : f32 to vector<8x1xf32>
      %c0_16 = arith.constant 0 : index
      %c0_17 = arith.constant 0 : index
      %29 = vector.load %arg7[%c0_16, %c0_17] : memref<8x1xf32, #tpu.memory_space<vmem>>, vector<8x1xf32>
      tpu.vector_store %arg7[%c0_16, %c0_17], %28 {strides = array<i32>} : memref<8x1xf32, #tpu.memory_space<vmem>>, vector<8x1xf32>,
    } else {
    }
    %c0 = arith.constant 0 : index
    %c0_1 = arith.constant 0 : index
    %c0_2 = arith.constant 0 : index
    %3 = vector.load %arg2[%c0, %c0_1, %c0_2] : memref<2x8x32xf32, #tpu.memory_space<vmem>>, vector<2x8x32xf32>
    %4 = vector.shape_cast %3 : vector<2x8x32xf32> to vector<16x32xf32>
    %c0_3 = arith.constant 0 : index
    %c0_4 = arith.constant 0 : index
    %5 = vector.load %arg3[%c0_3, %c0_4] : memref<32x32xf32, #tpu.memory_space<vmem>>, vector<32x32xf32>
    %cst = arith.constant dense<0.000000e+00> : vector<16x32xf32>
    %6 = tpu.matmul %4, %5, %cst {dimension_numbers = #tpu.dot_dimension_numbers<[1], [0], [0], [1], [0, 0, 1, 1], [], []>} : vector<16x32xf32>, vector<32x32xf32>, vector<16x32xf32> -> vector<16x32xf32>
    %c0_5 = arith.constant 0 : index
    %c0_6 = arith.constant 0 : index
    %7 = vector.load %arg4[%c0_5, %c0_6] : memref<2x32xf32, #tpu.memory_space<vmem>>, vector<2x32xf32>
    %8 = vector.extract_strided_slice %7 {offsets = [0, 0], sizes = [1, 32], strides = [1, 1]} : vector<2x32xf32> to vector<1x32xf32>
    %9 = vector.broadcast %8 : vector<1x32xf32> to vector<16x32xf32>
    %10 = arith.addf %6, %9 : vector<16x32xf32>
    %cst_7 = arith.constant 0.000000e+00 : f32
    %11 = vector.broadcast %cst_7 : f32 to vector<16x32xf32>
    %12 = arith.maximumf %10, %11 : vector<16x32xf32>
    %13 = vector.extract_strided_slice %12 {offsets = [0, 0], sizes = [8, 32], strides = [1, 1]} : vector<16x32xf32> to vector<8x32xf32>
    %14 = vector.extract_strided_slice %12 {offsets = [8, 0], sizes = [8, 32], strides = [1, 1]} : vector<16x32xf32> to vector<8x32xf32>
    %15 = arith.subf %13, %14 : vector<8x32xf32>
    %16 = math.absf %15 : vector<8x32xf32>
    %c0_8 = arith.constant 0 : index
    %c0_9 = arith.constant 0 : index
    %17 = vector.load %arg7[%c0_8, %c0_9] : memref<8x1xf32, #tpu.memory_space<vmem>>, vector<8x1xf32>
    %18 = vector.extract_strided_slice %7 {offsets = [1, 0], sizes = [1, 32], strides = [1, 1]} : vector<2x32xf32> to vector<1x32xf32>
    %19 = vector.broadcast %18 : vector<1x32xf32> to vector<8x32xf32>
    %20 = arith.mulf %16, %19 : vector<8x32xf32>
    %cst_10 = arith.constant dense<0.000000e+00> : vector<8xf32>
    %21 = vector.multi_reduction <add>, %20, %cst_10 [1] : vector<8x32xf32> to vector<8xf32>
    %22 = vector.shape_cast %21 : vector<8xf32> to vector<8x1xf32>
    %23 = arith.addf %17, %22 : vector<8x1xf32>
    %c0_11 = arith.constant 0 : index
    %c0_12 = arith.constant 0 : index
    %24 = vector.load %arg7[%c0_11, %c0_12] : memref<8x1xf32, #tpu.memory_space<vmem>>, vector<8x1xf32>
    tpu.vector_store %arg7[%c0_11, %c0_12], %23 {strides = array<i32>} : memref<8x1xf32, #tpu.memory_space<vmem>>, vector<8x1xf32>,
    %c0_i32_13 = arith.constant 0 : i32
    %25 = arith.cmpi eq, %arg1, %c0_i32_13 : i32
    %26 = arith.extui %25 : i1 to i32
    %c0_i32_14 = arith.constant 0 : i32
    %27 = arith.cmpi ne, %26, %c0_i32_14 : i32
    scf.if %27 {
      %c0_15 = arith.constant 0 : index
      %c0_16 = arith.constant 0 : index
      %28 = vector.load %arg7[%c0_15, %c0_16] : memref<8x1xf32, #tpu.memory_space<vmem>>, vector<8x1xf32>
      %c0_17 = arith.constant 0 : index
      %29 = memref.load %arg5[%c0_17] : memref<1xf32, #tpu.memory_space<smem>>
      %30 = vector.broadcast %29 : f32 to vector<8x1xf32>
      %31 = arith.addf %28, %30 : vector<8x1xf32>
      %c0_18 = arith.constant 0 : index
      %c0_19 = arith.constant 0 : index
      %32 = vector.load %arg6[%c0_18, %c0_19] : memref<8x1xf32, #tpu.memory_space<vmem>>, vector<8x1xf32>
      tpu.vector_store %arg6[%c0_18, %c0_19], %31 {strides = array<i32>} : memref<8x1xf32, #tpu.memory_space<vmem>>, vector<8x1xf32>,
    } else {
    }
    return
  }
  func.func @transform_0(%arg0: i32, %arg1: i32) -> (i32, i32, i32) {
    %c0_i32 = arith.constant 0 : i32
    %c0_i32_0 = arith.constant 0 : i32
    %c0_i32_1 = arith.constant 0 : i32
    return %c0_i32, %arg0, %c0_i32_0 : i32, i32, i32
  }
  func.func @transform_1(%arg0: i32, %arg1: i32) -> (i32, i32) {
    %c0_i32 = arith.constant 0 : i32
    %c0_i32_0 = arith.constant 0 : i32
    return %c0_i32, %arg1 : i32, i32
  }
  func.func @transform_2(%arg0: i32, %arg1: i32) -> (i32, i32) {
    %c0_i32 = arith.constant 0 : i32
    %c0_i32_0 = arith.constant 0 : i32
    return %c0_i32, %arg1 : i32, i32
  }
  func.func @transform_3(%arg0: i32, %arg1: i32) -> i32 {
    %c0_i32 = arith.constant 0 : i32
    %c0_i32_0 = arith.constant 0 : i32
    return %c0_i32 : i32
  }
  func.func @transform_4(%arg0: i32, %arg1: i32) -> (i32, i32) {
    %c0_i32 = arith.constant 0 : i32
    %c0_i32_0 = arith.constant 0 : i32
    return %arg0, %c0_i32 : i32, i32
  }
}

</mosaic_0001>

<bundles_post_ra>
// kernel: tpu_custom_call.1
= control target key start
LH: loop header
LB: loop body
LE: loop exit
PB: predicated region body
PF: predicated region fallthrough
CT: control target
= control target key end

     0   :  { %10 = vsyncpa [#allocation5], 0  ;;  %s294_s0 = inlined_call_operand.hbm [shape: f32[2,8,32], index: 0, kind: input, shape index: {}]   ;;  %s295_s1 = inlined_call_operand.hbm [shape: f32[32,32], index: 1, kind: input, shape index: {}]   ;;  %s296_s2 = inlined_call_operand.vmem [shape: f32[2,32], index: 2, kind: input, shape index: {}]   ;;  %s297_s3 = inlined_call_operand.<no memory space> [shape: f32[1], index: 3, kind: input, shape index: {}]   ;;  %s298_s4 = inlined_call_operand.vmem [shape: f32[8,1], index: 4, kind: output, shape index: {}]  }
   0x1   :  { %11 = vsyncpa [#allocation7], 0  ;;  %s243_s15 = smov [#allocation4]  }
   0x2   :  { %s17_s16 = sshll.u32 %s243_s15, 4  ;;  %s18_s16 = int_to_ptr.vmem [resolvable:$true] %s17_s16 }
   0x3   :  { %s207_s17 = scalar_lea.vmem %s18_s16, 256  ;;  %p212_p1 = scmp.lt.s32.totalorder %s18_s16, %s18_s16 }
   0x4   :  { %p208_p0 = scmp.ne.s32.totalorder %s18_s16, %s207_s17  ;;  %p213_p2 = scmp.lt.s32.totalorder %s207_s17, %s207_s17 }
   0x6   :  { %p214_p3 = por %p213_p2, %p212_p1 }
   0x8   :  { %p215_p4 = pnand %p214_p3, %p208_p0 }
   0xa   :  { %218 = shalt.err (!%p215_p4)
}
   0xb   :  { %s244_s18 = smov 128   ;;  %s245_s19 = smov 8  }
   0xc   :  { %23 = dma.hbm_to_vmem [thread:$0]  %s294_s0, 256, %s18_s16, [#allocation5], %s244_s18, %s244_s18, %s245_s19  }
   0xd   :  { %s246_s22 = smov [#allocation6]  }
   0xe   :  { %s29_s23 = sshll.u32 %s246_s22, 4  ;;  %s30_s23 = int_to_ptr.vmem [resolvable:$true] %s29_s23 }
   0xf   :  { %s227_s24 = scalar_lea.vmem %s30_s23, 512  ;;  %p232_p6 = scmp.lt.s32.totalorder %s30_s23, %s30_s23 }
  0x10   :  { %p228_p5 = scmp.ne.s32.totalorder %s30_s23, %s227_s24  ;;  %p233_p7 = scmp.lt.s32.totalorder %s227_s24, %s227_s24 }
  0x12   :  { %p234_p8 = por %p233_p7, %p232_p6 }
  0x14   :  { %p235_p9 = pnand %p234_p8, %p228_p5 }
  0x16   :  { %238 = shalt.err (!%p235_p9)
}
  0x17   :  { %35 = dma.hbm_to_vmem [thread:$0]  %s295_s1, 512, %s30_s23, [#allocation7], %s244_s18, %s244_s18, %s245_s19  }
  0x18   :  { %239 = dma.done.wait [#allocation5], 256  }
  0x19   :  { %240 = vsyncadd [#allocation5], 4294967040 }
  0x1a   :  { %241 = dma.done.wait [#allocation7], 512  }
  0x1b   :  { %242 = vsyncadd [#allocation7], 4294966784  ;;  %vm63_vm0 = vcmask 261120   ;;  %v57_v0 = vld [vmem:[#allocation6 + $0x18] sm:$0xff]  ;;  %v56_v1 = vld [vmem:[#allocation6 + $0x10] sm:$0xff]  ;;  %vm50_vm1 = vcmask 7168   ;;  %v59_v7 = vlaneseq  ;;  %v166_v27 = vstv %s297_s3 }
  0x1c   :  { %183 = vmatprep.subr.mxu0 %v57_v0  ;;  %v52_v2 = vld [vmem:[#allocation4] sm:$0xff]  ;;  %v55_v3 = vld [vmem:[#allocation6 + $0x8] sm:$0xff]  ;;  %v54_v4 = vld [vmem:[#allocation6] sm:$0xff]  ;;  %v247_v6 = vmov 0.0  }
  0x1d   :  { %184 = vmatpush3.msra.mxu0 %v57_v0  ;;  %191 = vmatprep.mubr.msk.f32.mxu0 %vm63_vm0, %v52_v2  ;;  %v53_v5 = vld [vmem:[#allocation4 + $0x8] sm:$0xff]  ;;  %51 = vst.msk [vmem:[#allocation2] sm:$0xff] %vm50_vm1, %v247_v6  ;;  %v60_v8 = vshrl.u32 %v59_v7, 7  ;;  %v58_v10 = vld [vmem:[%s296_s2] sm:$0x3] }
  0x1e   :  { %185 = vmatprep.subr.mxu0 %v56_v1 }
  0x1f   :  { %186 = vmatpush3.msra.mxu0 %v56_v1  ;;  %v61_v9 = vsub.s32 0, %v60_v8  ;;  %v152_v16 = vsub.s32 1, %v60_v8 }
  0x20   :  { %187 = vmatprep.subr.mxu0 %v55_v3 }
  0x21   :  { %188 = vmatpush3.msra.mxu0 %v55_v3  ;;  %v62_v11 = vrot.slane %v58_v10, %v61_v9  ;;  %v153_v20 = vrot.slane %v58_v10, %v152_v16 }
  0x22   :  { %189 = vmatprep.subr.mxu0 %v54_v4 }
  0x23   :  { %190 = vmatpush3.msra.mxu0 %v54_v4 }
  0x24   :  { %192 = vmatmul.mubr.msk.f32.vlgmr.msra.gmra.mxu0 %vm63_vm0, %v53_v5  ;;  %v149_v24 = vld [vmem:[#allocation2] sm:$0xff] }
  0xe4   :  { %v193_v12 = vpop.f32.mrf.mxu0 }
  0xe5   :  { %v142_v13 = vadd.f32 %v193_v12, %v62_v11 }
  0xe6   :  { %v136_v14 = vpop.f32.mrf.mxu0 }
  0xe7   :  { %v137_v15 = vadd.f32 %v136_v14, %v62_v11  ;;  %v146_v17 = vmax.f32 %v142_v13, 0.0 }
  0xe9   :  { %v145_v18 = vmax.f32 %v137_v15, 0.0 }
  0xeb   :  { %v147_v19 = vsub.f32 %v145_v18, %v146_v17 }
  0xed   :  { %v148_v21 = vand.u32 2147483647, %v147_v19 }
  0xef   :  { %v154_v22 = vmul.f32 %v153_v20, %v148_v21 }
  0xf1   :  { %v155_v23 = vsel %vm63_vm0, %v154_v22, 0.0 }
  0xf2   :  { %156 = vadd.xlane.f32.xlu0 %v155_v23 }
 0x17b   :  { %v157_v25 = vpop.xlane.xlu0 %156 }
 0x17c   :  { %v158_v26 = vadd.f32 %v157_v25, %v149_v24 }
 0x17e   :  { %160 = vst.msk [vmem:[#allocation2] sm:$0xff] %vm50_vm1, %v158_v26 }
 0x185   :  { %v164_v28 = vld [vmem:[#allocation2] sm:$0xff] }
 0x186   :  { %v167_v29 = vadd.f32 %v166_v27, %v164_v28 }
 0x188   :  { %168 = vst.msk [vmem:[%s298_s4] sm:$0xff] %vm50_vm1, %v167_v29 }
 0x189   :  { %173 = vsyncpa [#allocation5], 1 }
 0x18a   :  { %174 = vsyncpa [#allocation7], 1 }

</bundles_post_ra>
